<compile_context>
chip_gen: v7x
topology: tpu7x:2x2x1
jax: 0.10.0
libtpu: 0.0.40
codegen_flags: <defaults>
</compile_context>

<pallas_src>
import functools

import jax
import jax.numpy as jnp
import numpy as np
from jax.experimental import pallas as pl
from jax.experimental.pallas import tpu as pltpu


def _gem_kernel(p_ref, x_ref, o_ref, *, eps: float, inv_hw: float, integer_p):
    p = p_ref[0]                                    # scalar p from SMEM
    x = x_ref[...].astype(jnp.float32)              # (rows_blk, H*W), lane-dense
    xc = jnp.maximum(x, eps)                        # clamp(min=eps)  ->  always > 0

    if integer_p is None:
        xp = jnp.exp(p * jnp.log(xc))               # xc ** p          (EUP: log + exp)
        inv_p = 1.0 / p                             # scalar divide, once per step
    else:
        xp = xc                                     # xc ** p          (VPU-only fast path)
        for _ in range(int(integer_p) - 1):
            xp = xp * xc
        inv_p = 1.0 / float(integer_p)

    # Mean over the spatial axis (lane reduce on the XLU), then the 1/p root.
    # The root only touches rows_blk elements per step -> negligible EUP cost.
    m = jnp.sum(xp, axis=1, keepdims=True) * inv_hw          # (rows_blk, 1)
    o_ref[...] = jnp.exp(jnp.log(m) * inv_p)                 # m ** (1/p)


def _pick_block_rows(n_rows: int, hw: int, itemsize: int,
                     vmem_block_budget: int = 4 << 20) -> int:
    """Pick the per-step row count for the (rows, H*W) slab.

    Targets: x block <= `vmem_block_budget` bytes, rows_blk a multiple of 8
    (sublane tiling) or the full row extent, exact divisors preferred (no
    partial tail), and grid length >= 2 when cheaply possible (megacore)."""
    bytes_per_row = max(hw * itemsize, 1)
    max_rows = max(8, (vmem_block_budget // bytes_per_row) // 8 * 8)

    if n_rows <= max_rows:
        # Whole problem fits one block.  Split into two clean blocks if we can,
        # so a megacore part has two parallel grid steps to shard.
        if n_rows % 16 == 0 and n_rows >= 16:
            return n_rows // 2
        return n_rows                      # full-extent block is always legal

    # Too big for one block: prefer the largest multiple-of-8 exact divisor.
    for d in range(max_rows, 7, -8):
        if n_rows % d == 0:
            return d
    return max_rows                        # cdiv grid; tail block is masked


def gem_pool(x, p, *, eps: float = 1e-6, integer_p=None,
             vmem_block_budget: int = 4 << 20):
    """GeM pooling.  x: (B, C, H, W);  p: (1,) float32 parameter.  Returns (B, C) f32."""
    B, C, H, W = x.shape
    rows = B * C
    hw = H * W

    # Free, layout-preserving reshape (no transpose, no extra HBM pass).
    xr = x.reshape(rows, hw)

    rows_blk = _pick_block_rows(rows, hw, xr.dtype.itemsize, vmem_block_budget)
    grid = (pl.cdiv(rows, rows_blk),)

    kernel = functools.partial(_gem_kernel, eps=eps, inv_hw=1.0 / hw,
                               integer_p=integer_p)

    out = pl.pallas_call(
        kernel,
        out_shape=jax.ShapeDtypeStruct((rows, 1), jnp.float32),
        grid=grid,
        in_specs=[
            pl.BlockSpec(memory_space=pltpu.MemorySpace.SMEM),   # p (grid-invariant scalar)
            pl.BlockSpec((rows_blk, hw), lambda i: (i, 0)),      # x row-slab, lane-dense
        ],
        out_specs=pl.BlockSpec((rows_blk, 1), lambda i: (i, 0)),
        compiler_params=pltpu.CompilerParams(
            dimension_semantics=("parallel",)),
    )(p, xr)

    return out.reshape(B, C)


def reference(x, p, eps: float = 1e-6):
    """Pure-JAX transcription of the PyTorch GeM forward."""
    ps = p.reshape(())
    pooled = jnp.mean(jnp.maximum(x, eps) ** ps, axis=(2, 3))   # AdaptiveAvgPool2d(1)
    return pooled ** (1.0 / ps)                                 # (B, C)


if __name__ == "__main__":
    B, C, H, W = 2, 4, 16, 16
    key = jax.random.PRNGKey(0)
    x = jax.random.uniform(key, (B, C, H, W), jnp.float32, 0.01, 1.0)
    p = jnp.full((1,), 3.0, jnp.float32)          # GeM's learnable p (default 3)

    out = jax.block_until_ready(gem_pool(x, p))
    ref = reference(x, p)
    np.testing.assert_allclose(np.asarray(out), np.asarray(ref),
                               rtol=2e-3, atol=1e-6)

    # Frozen-integer-p fast path (VPU-only pow; relevant when the single EUP
    # would otherwise be the binding slot for this mem-bound kernel).
    out_fast = jax.block_until_ready(gem_pool(x, p, integer_p=3))
    np.testing.assert_allclose(np.asarray(out_fast), np.asarray(ref),
                               rtol=2e-3, atol=1e-6)

    print("KERNEL_OK")
</pallas_src>

<mosaic_0001>
module attributes {stable_mosaic.version = 11 : i64} {
  func.func @_gem_kernel(%arg0: i32, %arg1: memref<1xf32, #tpu.memory_space<smem>>, %arg2: memref<8x256xf32, #tpu.memory_space<vmem>>, %arg3: memref<8x1xf32, #tpu.memory_space<vmem>>) attributes {dimension_semantics = [#tpu.dimension_semantics<parallel>], iteration_bounds = array<i64: 1>, scalar_prefetch = 0 : i64, scratch_operands = 0 : i64, tpu.core_type = #tpu.core_type<tc>, window_params = [{transform_indices = @transform_0, window_bounds = array<i64: 1>}, {transform_indices = @transform_1, window_bounds = array<i64: 8, 256>}, {transform_indices = @transform_2, window_bounds = array<i64: 8, 1>}]} {
    %c0 = arith.constant 0 : index
    %0 = memref.load %arg1[%c0] : memref<1xf32, #tpu.memory_space<smem>>
    %c0_0 = arith.constant 0 : index
    %c0_1 = arith.constant 0 : index
    %1 = vector.load %arg2[%c0_0, %c0_1] : memref<8x256xf32, #tpu.memory_space<vmem>>, vector<8x256xf32>
    %cst = arith.constant 9.99999997E-7 : f32
    %2 = vector.broadcast %cst : f32 to vector<8x256xf32>
    %3 = arith.maximumf %1, %2 : vector<8x256xf32>
    %4 = math.log %3 : vector<8x256xf32>
    %5 = vector.broadcast %0 : f32 to vector<8x256xf32>
    %6 = arith.mulf %5, %4 : vector<8x256xf32>
    %7 = math.exp %6 : vector<8x256xf32>
    %cst_2 = arith.constant 1.000000e+00 : f32
    %8 = arith.divf %cst_2, %0 : f32
    %cst_3 = arith.constant dense<0.000000e+00> : vector<8xf32>
    %9 = vector.multi_reduction <add>, %7, %cst_3 [1] : vector<8x256xf32> to vector<8xf32>
    %10 = vector.shape_cast %9 : vector<8xf32> to vector<8x1xf32>
    %cst_4 = arith.constant 3.906250e-03 : f32
    %11 = vector.broadcast %cst_4 : f32 to vector<8x1xf32>
    %12 = arith.mulf %10, %11 : vector<8x1xf32>
    %13 = math.log %12 : vector<8x1xf32>
    %14 = vector.broadcast %8 : f32 to vector<8x1xf32>
    %15 = arith.mulf %13, %14 : vector<8x1xf32>
    %16 = math.exp %15 : vector<8x1xf32>
    %c0_5 = arith.constant 0 : index
    %c0_6 = arith.constant 0 : index
    %17 = vector.load %arg3[%c0_5, %c0_6] : memref<8x1xf32, #tpu.memory_space<vmem>>, vector<8x1xf32>
    tpu.vector_store %arg3[%c0_5, %c0_6], %16 {strides = array<i32>} : memref<8x1xf32, #tpu.memory_space<vmem>>, vector<8x1xf32>,
    return
  }
  func.func @transform_0(%arg0: i32) -> i32 {
    %c0_i32 = arith.constant 0 : i32
    %c0_i32_0 = arith.constant 0 : i32
    return %c0_i32 : i32
  }
  func.func @transform_1(%arg0: i32) -> (i32, i32) {
    %c0_i32 = arith.constant 0 : i32
    %c0_i32_0 = arith.constant 0 : i32
    return %arg0, %c0_i32 : i32, i32
  }
  func.func @transform_2(%arg0: i32) -> (i32, i32) {
    %c0_i32 = arith.constant 0 : i32
    %c0_i32_0 = arith.constant 0 : i32
    return %arg0, %c0_i32 : i32, i32
  }
}

</mosaic_0001>

<bundles_post_ra>
// kernel: tpu_custom_call.1
= control target key start
LH: loop header
LB: loop body
LE: loop exit
PB: predicated region body
PF: predicated region fallthrough
CT: control target
= control target key end

     0   :  { %8 = vsyncpa [#allocation4], 0  ;;  %s101_s9 = smov [#allocation3]   ;;  %s135_s0 = inlined_call_operand.<no memory space> [shape: f32[1], index: 0, kind: input, shape index: {}]   ;;  %s136_s1 = inlined_call_operand.hbm [shape: f32[8,256], index: 1, kind: input, shape index: {}]   ;;  %s137_s2 = inlined_call_operand.vmem [shape: f32[8,1], index: 2, kind: output, shape index: {}]  }
   0x1   :  { %s17_s10 = sshll.u32 %s101_s9, 4  ;;  %s77_s13 = scalar_lea.hbm %s136_s1, 256  ;;  %s18_s10 = int_to_ptr.vmem [resolvable:$true] %s17_s10 }
   0x2   :  { %p78_p0 = scmp.ne.s32.totalorder %s136_s1, %s77_s13  ;;  %p81_p1 = scmp.lt.u32.totalorder %s77_s13, %s136_s1 }
   0x4   :  { %p83_p2 = pnand %p81_p1, %p78_p0 }
   0x6   :  { %86 = shalt.err (!%p83_p2)
}
   0x7   :  { %s87_s18 = scalar_lea.vmem %s18_s10, 256  ;;  %p92_p4 = scmp.lt.s32.totalorder %s18_s10, %s18_s10 }
   0x8   :  { %p88_p3 = scmp.ne.s32.totalorder %s18_s10, %s87_s18  ;;  %p93_p5 = scmp.lt.s32.totalorder %s87_s18, %s87_s18 }
   0xa   :  { %p94_p6 = por %p93_p5, %p92_p4 }
   0xc   :  { %p95_p7 = pnand %p94_p6, %p88_p3 }
   0xe   :  { %98 = shalt.err (!%p95_p7)
}
   0xf   :  { %20 = dma.hbm_to_vmem [thread:$0]  %s136_s1, 256, %s18_s10, [#allocation4]  }
  0x10   :  { %99 = dma.done.wait [#allocation4], 256  }
  0x11   :  { %100 = vsyncadd [#allocation4], 4294967040  ;;  %v33_v0 = vstv %s135_s0  ;;  %v25_v1 = vld [vmem:[#allocation3] sm:$0xff]  ;;  %v26_v2 = vld [vmem:[#allocation3 + $0x8] sm:$0xff]  ;;  %vm53_vm0 = vcmask 7168  }
  0x12   :  { %63 = vrcp.f32 %v33_v0  ;;  %v27_v3 = vmax.f32 %v25_v1, 1e-06  ;;  %v28_v4 = vmax.f32 %v26_v2, 1e-06 }
  0x14   :  { %65 = vlog2.f32 %v27_v3 }
  0x15   :  { %67 = vlog2.f32 %v28_v4 }
  0x1c   :  { %v64_v5 = vpop.eup %63 }
  0x1d   :  { %60 = vpush %v64_v5 }
  0x1e   :  { %v66_v6 = vpop.eup %65 }
  0x1f   :  { %v68_v7 = vpop.eup %67  ;;  %v30_v8 = vmul.f32 0.6931472, %v66_v6 }
  0x20   :  { %v32_v9 = vmul.f32 0.6931472, %v68_v7 }
  0x21   :  { %v34_v10 = vmul.f32 %v33_v0, %v30_v8 }
  0x22   :  { %v35_v11 = vmul.f32 %v33_v0, %v32_v9 }
  0x23   :  { %v36_v12 = vmul.f32 1.442695, %v34_v10 }
  0x24   :  { %v38_v13 = vmul.f32 1.442695, %v35_v11 }
  0x25   :  { %69 = vpow2.f32 %v36_v12 }
  0x26   :  { %71 = vpow2.f32 %v38_v13 }
  0x2f   :  { %v70_v14 = vpop.eup %69 }
  0x30   :  { %v72_v15 = vpop.eup %71 }
  0x31   :  { %v43_v16 = vadd.f32 %v72_v15, %v70_v14 }
  0x33   :  { %44 = vadd.xlane.f32.xlu0 %v43_v16 }
  0x4e   :  { %s61_s0 = spop %60 }
  0x4f   :  { %v49_v20 = vstv %s61_s0 }
  0xc0   :  { %v45_v17 = vpop.xlane.xlu0 %44 }
  0xc1   :  { %v46_v18 = vmul.f32 0.00390625, %v45_v17 }
  0xc3   :  { %73 = vlog2.f32 %v46_v18 }
  0xcd   :  { %v74_v19 = vpop.eup %73 }
  0xce   :  { %v48_v21 = vmul.f32 0.6931472, %v74_v19 }
  0xd0   :  { %v50_v22 = vmul.f32 %v49_v20, %v48_v21 }
  0xd2   :  { %v51_v23 = vmul.f32 1.442695, %v50_v22 }
  0xd4   :  { %75 = vpow2.f32 %v51_v23 }
  0xde   :  { %v76_v24 = vpop.eup %75 }
  0xdf   :  { %54 = vst.msk [vmem:[%s137_s2] sm:$0xff] %vm53_vm0, %v76_v24 }
  0xe0   :  { %59 = vsyncpa [#allocation4], 1 }

</bundles_post_ra>
